<compile_context>
chip_gen: v5e
topology: v5e:2x2
jax: 0.10.0
libtpu: 0.0.40
codegen_flags: <defaults>
</compile_context>

<pallas_src>
import math

import jax
import jax.numpy as jnp
from jax.experimental import pallas as pl
from jax.experimental.pallas import tpu as pltpu

ACT_DTYPE = jnp.bfloat16
_VMEM_LIMIT = 64 * 1024 * 1024


# ----------------------------------------------------------------------------- helpers
def _ru(x, m):
    return (x + m - 1) // m * m


def _cdiv(a, b):
    return (a + b - 1) // b


# ----------------------------------------------------------------------------- Pallas: full-K matmul (+bias, optional ReLU)
_MM_CACHE = {}


def _mm_call(Mp, K, Nout, tm, relu, out_dtype):
    key = (Mp, K, Nout, tm, relu, out_dtype)
    if key in _MM_CACHE:
        return _MM_CACHE[key]

    def kernel(x_ref, w_ref, b_ref, o_ref):
        y = jnp.dot(x_ref[...], w_ref[...], preferred_element_type=jnp.float32)
        y = y + b_ref[...]
        if relu:
            y = jnp.maximum(y, 0.0)
        o_ref[...] = y.astype(o_ref.dtype)

    fn = pl.pallas_call(
        kernel,
        out_shape=jax.ShapeDtypeStruct((Mp, Nout), out_dtype),
        grid_spec=pltpu.PrefetchScalarGridSpec(
            num_scalar_prefetch=0,
            grid=(Mp // tm,),
            in_specs=[
                pl.BlockSpec((tm, K), lambda i: (i, 0)),        # activations stream
                pl.BlockSpec((K, Nout), lambda i: (0, 0)),      # resident weights
                pl.BlockSpec((1, Nout), lambda i: (0, 0)),      # resident bias
            ],
            out_specs=pl.BlockSpec((tm, Nout), lambda i: (i, 0)),
        ),
        compiler_params=pltpu.CompilerParams(
            dimension_semantics=("parallel",),
            vmem_limit_bytes=_VMEM_LIMIT),
    )
    _MM_CACHE[key] = fn
    return fn


def matmul_bias_act(x, w, b, relu, out_dtype=ACT_DTYPE):
    """(x @ w) + b (optionally ReLU).  x:(M,K), w:(K,N), b:(N,).  bf16 operands, f32 acc."""
    M, K = x.shape
    Nout = w.shape[1]
    tm = min(512, _ru(M, 8))
    Mp = _ru(M, tm)
    xp = x.astype(ACT_DTYPE)
    if Mp != M:
        xp = jnp.pad(xp, ((0, Mp - M), (0, 0)))
    out = _mm_call(Mp, K, Nout, tm, relu, out_dtype)(
        xp, w.astype(ACT_DTYPE), b.reshape(1, Nout).astype(jnp.float32))
    if Mp != M:
        out = out[:M]
    return out


# ----------------------------------------------------------------------------- Pallas: fused stride-1 conv (tap loop inside kernel)
_CONV_CACHE = {}


def _conv_s1_call(nb, tm, Cin, Cout, taps, relu):
    key = (nb, tm, Cin, Cout, taps, relu)
    if key in _CONV_CACHE:
        return _CONV_CACHE[key]
    KK = len(taps)

    def kernel(xa_ref, xb_ref, w_ref, b_ref, o_ref, xs_ref, acc_ref):
        # Stage two consecutive row-blocks so tap-shifted windows are in VMEM.
        xs_ref[pl.ds(0, tm), :] = xa_ref[...]
        xs_ref[pl.ds(tm, tm), :] = xb_ref[...]
        acc_ref[...] = jnp.zeros_like(acc_ref)
        for t_idx in range(KK):
            t = taps[t_idx]
            acc_ref[...] += jnp.dot(
                xs_ref[pl.ds(t, tm), :],
                w_ref[pl.ds(t_idx * Cin, Cin), :],
                preferred_element_type=jnp.float32)
        y = acc_ref[...] + b_ref[...]
        if relu:
            y = jnp.maximum(y, 0.0)
        o_ref[...] = y.astype(o_ref.dtype)

    fn = pl.pallas_call(
        kernel,
        out_shape=jax.ShapeDtypeStruct((nb * tm, Cout), ACT_DTYPE),
        grid_spec=pltpu.PrefetchScalarGridSpec(
            num_scalar_prefetch=0,
            grid=(nb,),
            in_specs=[
                pl.BlockSpec((tm, Cin), lambda i: (i, 0)),       # row block i
                pl.BlockSpec((tm, Cin), lambda i: (i + 1, 0)),   # row block i+1 (overlap)
                pl.BlockSpec((KK * Cin, Cout), lambda i: (0, 0)),  # resident weights
                pl.BlockSpec((1, Cout), lambda i: (0, 0)),         # resident bias
            ],
            out_specs=pl.BlockSpec((tm, Cout), lambda i: (i, 0)),
            scratch_shapes=[
                pltpu.VMEM((2 * tm, Cin), ACT_DTYPE),
                pltpu.VMEM((tm, Cout), jnp.float32),
            ],
        ),
        compiler_params=pltpu.CompilerParams(
            dimension_semantics=("parallel",),
            vmem_limit_bytes=_VMEM_LIMIT),
    )
    _CONV_CACHE[key] = fn
    return fn


def conv_s1_fused(x, w, b, padding, relu):
    """Stride-1 conv via flattened-shift fused kernel.  x:(N,H,W,Cin), w:(kh,kw,Cin,Cout)."""
    kh, kw, Cin, Cout = w.shape
    ph, pw = padding
    N, H, W, _ = x.shape
    Hp, Wp = H + 2 * ph, W + 2 * pw
    Ho, Wo = Hp - kh + 1, Wp - kw + 1
    taps = tuple(di * Wp + dj for di in range(kh) for dj in range(kw))
    tmax = taps[-1]
    M = N * Hp * Wp
    tm = min(512, _ru(max(M, tmax + 8), 8))
    assert tmax < tm, "row tile too small for tap window"
    nb = _cdiv(M, tm)
    rows = (nb + 1) * tm

    xp = x.astype(ACT_DTYPE)
    if ph or pw:
        xp = jnp.pad(xp, ((0, 0), (ph, ph), (pw, pw), (0, 0)))
    xf = xp.reshape(N * Hp * Wp, Cin)
    xf = jnp.pad(xf, ((0, rows - M), (0, 0)))
    wf = w.reshape(kh * kw * Cin, Cout).astype(ACT_DTYPE)
    bf = b.reshape(1, Cout).astype(jnp.float32)

    y = _conv_s1_call(nb, tm, Cin, Cout, taps, relu)(xf, xf, wf, bf)
    if nb * tm != M:
        y = y[:M]
    y = y.reshape(N, Hp, Wp, Cout)
    if Ho != Hp or Wo != Wp:
        y = y[:, :Ho, :Wo, :]
    return y


def conv_im2col(x, w, b, stride, padding, relu):
    """Fallback path for the few strided convs (small patch tensors, bf16)."""
    kh, kw, Cin, Cout = w.shape
    sh, sw = stride
    ph, pw = padding
    N = x.shape[0]
    xp = x.astype(ACT_DTYPE)
    if ph or pw:
        xp = jnp.pad(xp, ((0, 0), (ph, ph), (pw, pw), (0, 0)))
    Hp, Wp = xp.shape[1], xp.shape[2]
    Ho = (Hp - kh) // sh + 1
    Wo = (Wp - kw) // sw + 1
    cols = []
    for i in range(kh):
        for j in range(kw):
            cols.append(xp[:, i:i + sh * Ho:sh, j:j + sw * Wo:sw, :])
    patches = jnp.stack(cols, axis=3).reshape(N * Ho * Wo, kh * kw * Cin)
    y = matmul_bias_act(patches, w.reshape(kh * kw * Cin, Cout), b, relu)
    return y.reshape(N, Ho, Wo, Cout)


def basic_conv(p, x, relu=True):
    """BasicConvBlock: Conv2d(bias=False) + folded BatchNorm (scale into W) + ReLU."""
    w = p["w"] * p["scale"][None, None, None, :]
    b = p["bias"]
    kh, kw, Cin, Cout = p["w"].shape
    stride, padding = p["stride"], p["padding"]
    if (kh, kw) == (1, 1) and stride == (1, 1):
        N, H, W, _ = x.shape
        y = matmul_bias_act(x.reshape(N * H * W, Cin), w.reshape(Cin, Cout), b, relu)
        return y.reshape(N, H, W, Cout)
    if stride == (1, 1):
        return conv_s1_fused(x, w, b, padding, relu)
    return conv_im2col(x, w, b, stride, padding, relu)


def fused_1x1(plist, x, relu=True):
    """Fuse several 1x1 convs that share the same input into one matmul (concat on N)."""
    N, H, W, Cin = x.shape
    ws, bs, widths = [], [], []
    for p in plist:
        ws.append(p["w"].reshape(Cin, -1) * p["scale"][None, :])
        bs.append(p["bias"])
        widths.append(p["w"].shape[-1])
    w = jnp.concatenate(ws, axis=1)
    b = jnp.concatenate(bs)
    y = matmul_bias_act(x.reshape(N * H * W, Cin), w, b, relu)
    y = y.reshape(N, H, W, sum(widths))
    outs, off = [], 0
    for c in widths:
        outs.append(y[..., off:off + c])
        off += c
    return outs


# ----------------------------------------------------------------------------- Pallas: pooling
_AVG3_CACHE = {}


def _avgpool3_call(N, H, W, C):
    key = (N, H, W, C)
    if key in _AVG3_CACHE:
        return _AVG3_CACHE[key]
    Hp, Wp = H + 2, W + 2

    def kernel(x_ref, o_ref):
        x = x_ref[...]                                 # (1, Hp, Wp, C)
        acc = jnp.zeros((1, H, W, C), jnp.float32)
        for di in range(3):
            for dj in range(3):
                acc = acc + x[:, di:di + H, dj:dj + W, :].astype(jnp.float32)
        o_ref[...] = (acc * (1.0 / 9.0)).astype(o_ref.dtype)

    fn = pl.pallas_call(
        kernel,
        out_shape=jax.ShapeDtypeStruct((N, H, W, C), ACT_DTYPE),
        grid_spec=pltpu.PrefetchScalarGridSpec(
            num_scalar_prefetch=0,
            grid=(N,),
            in_specs=[pl.BlockSpec((1, Hp, Wp, C), lambda n: (n, 0, 0, 0))],
            out_specs=pl.BlockSpec((1, H, W, C), lambda n: (n, 0, 0, 0))),
        compiler_params=pltpu.CompilerParams(
            dimension_semantics=("parallel",),
            vmem_limit_bytes=_VMEM_LIMIT),
    )
    _AVG3_CACHE[key] = fn
    return fn


def avg_pool_3x3_s1(x):
    """AvgPool2d(3, stride=1, padding=1) with count_include_pad=True (PyTorch default)."""
    N, H, W, C = x.shape
    xp = jnp.pad(x.astype(ACT_DTYPE), ((0, 0), (1, 1), (1, 1), (0, 0)))
    return _avgpool3_call(N, H, W, C)(xp)


_GMAX_CACHE = {}


def _global_max_call(N, H, W, C):
    key = (N, H, W, C)
    if key in _GMAX_CACHE:
        return _GMAX_CACHE[key]

    def kernel(x_ref, o_ref):
        o_ref[...] = jnp.max(x_ref[...], axis=(1, 2)).astype(o_ref.dtype)

    fn = pl.pallas_call(
        kernel,
        out_shape=jax.ShapeDtypeStruct((N, C), ACT_DTYPE),
        grid_spec=pltpu.PrefetchScalarGridSpec(
            num_scalar_prefetch=0,
            grid=(N,),
            in_specs=[pl.BlockSpec((1, H, W, C), lambda n: (n, 0, 0, 0))],
            out_specs=pl.BlockSpec((1, C), lambda n: (n, 0))),
        compiler_params=pltpu.CompilerParams(
            dimension_semantics=("parallel",),
            vmem_limit_bytes=_VMEM_LIMIT),
    )
    _GMAX_CACHE[key] = fn
    return fn


def global_max_pool(x):
    """MaxPool2d(kernel_size=H, stride=1) when kernel == spatial size (head pool)."""
    N, H, W, C = x.shape
    return _global_max_call(N, H, W, C)(x.astype(ACT_DTYPE))


_POOL_CACHE = {}


def _pool_reduce_call(Mp, KK, C, op, tm):
    key = (Mp, KK, C, op, tm)
    if key in _POOL_CACHE:
        return _POOL_CACHE[key]
    inv = 1.0 / KK

    def kernel(x_ref, o_ref):
        x = x_ref[...]
        if op == "max":
            o_ref[...] = jnp.max(x, axis=1).astype(o_ref.dtype)
        else:
            o_ref[...] = (jnp.sum(x.astype(jnp.float32), axis=1) * inv).astype(o_ref.dtype)

    fn = pl.pallas_call(
        kernel,
        out_shape=jax.ShapeDtypeStruct((Mp, C), ACT_DTYPE),
        grid_spec=pltpu.PrefetchScalarGridSpec(
            num_scalar_prefetch=0,
            grid=(Mp // tm,),
            in_specs=[pl.BlockSpec((tm, KK, C), lambda i: (i, 0, 0))],
            out_specs=pl.BlockSpec((tm, C), lambda i: (i, 0))),
        compiler_params=pltpu.CompilerParams(
            dimension_semantics=("parallel",),
            vmem_limit_bytes=_VMEM_LIMIT),
    )
    _POOL_CACHE[key] = fn
    return fn


def pool2d_window(x, ksize, stride, op):
    """Window-stack + Pallas reduce (only used for the few strided pools; no padding)."""
    N, H, W, C = x.shape
    kh = kw = ksize
    sh = sw = stride
    Ho = (H - kh) // sh + 1
    Wo = (W - kw) // sw + 1
    xp = x.astype(ACT_DTYPE)
    cols = []
    for i in range(kh):
        for j in range(kw):
            cols.append(xp[:, i:i + sh * Ho:sh, j:j + sw * Wo:sw, :])
    win = jnp.stack(cols, axis=3).reshape(N * Ho * Wo, kh * kw, C)
    M, KK = win.shape[0], kh * kw
    budget = 2 * 1024 * 1024
    tm = max(8, min(256, (budget // (KK * C * 2)) // 8 * 8))
    Mp = _ru(M, tm)
    if Mp != M:
        win = jnp.pad(win, ((0, Mp - M), (0, 0), (0, 0)))
    out = _pool_reduce_call(Mp, KK, C, op, tm)(win)
    return out[:M].reshape(N, Ho, Wo, C)


# ----------------------------------------------------------------------------- parameters
class ParamGen:
    def __init__(self, key):
        self._key = key
        self._i = 0

    def _next(self):
        self._i += 1
        return jax.random.fold_in(self._key, self._i)

    def conv(self, cin, cout, ksize, stride=1, padding=0):
        kh, kw = (ksize, ksize) if isinstance(ksize, int) else ksize
        sh, sw = (stride, stride) if isinstance(stride, int) else stride
        ph, pw = (padding, padding) if isinstance(padding, int) else padding
        fan_in = kh * kw * cin
        w = jax.random.normal(self._next(), (kh, kw, cin, cout),
                              jnp.float32) * math.sqrt(2.0 / fan_in)
        return dict(w=w,
                    scale=jnp.ones((cout,), jnp.float32),   # BN gamma/sqrt(var+eps) folded
                    bias=jnp.zeros((cout,), jnp.float32),   # BN beta - mean*scale folded
                    stride=(sh, sw), padding=(ph, pw))

    def linear(self, cin, cout):
        w = jax.random.normal(self._next(), (cin, cout),
                              jnp.float32) * math.sqrt(1.0 / cin)
        return dict(w=w, b=jnp.zeros((cout,), jnp.float32))


def linear(p, x):
    return matmul_bias_act(x, p["w"], p["b"], relu=False, out_dtype=jnp.float32)


# ----------------------------------------------------------------------------- Inception block params
def incA_params(pg, cin, outs):
    c1, c5r, c5, c3r, c3, cp = outs
    return dict(
        b1=pg.conv(cin, c1, 1),
        b2a=pg.conv(cin, c5r, 1), b2b=pg.conv(c5r, c5, 5, padding=2),
        b3a=pg.conv(cin, c3r, 1), b3b=pg.conv(c3r, c3, 3, padding=1),
        b3c=pg.conv(c3, c3, 3, padding=1),
        bp=pg.conv(cin, cp, 1),
    )


def incD_params(pg, cin, outs):   # 35x35 -> 17x17 reduction
    r1, o1, r2, o2 = outs
    return dict(
        b1a=pg.conv(cin, r1, 1), b1b=pg.conv(r1, o1, 3, stride=2),
        b2a=pg.conv(cin, r2, 1), b2b=pg.conv(r2, o2, 3, padding=1),
        b2c=pg.conv(o2, o2, 3, stride=2),
    )


def incB_params(pg, cin, outs):   # 7x7-factorized block at 17x17
    c1, c7a, o2, c7b, o3, cp = outs
    return dict(
        b1=pg.conv(cin, c1, 1),
        b2a=pg.conv(cin, c7a, 1),
        b2b=pg.conv(c7a, c7a, (1, 7), padding=(0, 3)),
        b2c=pg.conv(c7a, o2, (7, 1), padding=(3, 0)),
        b3a=pg.conv(cin, c7b, 1),
        b3b=pg.conv(c7b, c7b, (7, 1), padding=(3, 0)),
        b3c=pg.conv(c7b, c7b, (1, 7), padding=(0, 3)),
        b3d=pg.conv(c7b, c7b, (7, 1), padding=(3, 0)),
        b3e=pg.conv(c7b, o3, (1, 7), padding=(0, 3)),
        bp=pg.conv(cin, cp, 1),
    )


def incE_params(pg, cin, outs):   # 17x17 -> 8x8 reduction
    r1, o1, r2, o2 = outs
    return dict(
        b1a=pg.conv(cin, r1, 1), b1b=pg.conv(r1, o1, 3, stride=2),
        b2a=pg.conv(cin, r2, 1),
        b2b=pg.conv(r2, r2, (1, 7), padding=(0, 3)),
        b2c=pg.conv(r2, r2, (7, 1), padding=(3, 0)),
        b2d=pg.conv(r2, o2, 3, stride=2),
    )


def incC_params(pg, cin, outs):   # expanded block at 8x8
    c1, c3r, c3, cdr, cd, cp = outs
    return dict(
        b1=pg.conv(cin, c1, 1),
        b2a=pg.conv(cin, c3r, 1),
        b2b=pg.conv(c3r, c3, (1, 3), padding=(0, 1)),
        b2c=pg.conv(c3r, c3, (3, 1), padding=(1, 0)),
        b3a=pg.conv(cin, cdr, 1),
        b3b=pg.conv(cdr, cd, 3, padding=1),
        b3c=pg.conv(cd, cd, (1, 3), padding=(0, 1)),
        b3d=pg.conv(cd, cd, (3, 1), padding=(1, 0)),
        bp=pg.conv(cin, cp, 1),
    )


# ----------------------------------------------------------------------------- Inception block forwards (shared-input 1x1s fused)
def incA_fwd(p, x):
    y1, y2, y3 = fused_1x1([p["b1"], p["b2a"], p["b3a"]], x)
    b1 = y1
    b2 = basic_conv(p["b2b"], y2)
    b3 = basic_conv(p["b3c"], basic_conv(p["b3b"], y3))
    bp = basic_conv(p["bp"], avg_pool_3x3_s1(x))
    return jnp.concatenate([b1, b2, b3, bp], axis=-1)


def incD_fwd(p, x):
    y1, y2 = fused_1x1([p["b1a"], p["b2a"]], x)
    b1 = basic_conv(p["b1b"], y1)
    b2 = basic_conv(p["b2c"], basic_conv(p["b2b"], y2))
    bp = pool2d_window(x, 3, 2, "max")
    return jnp.concatenate([b1, b2, bp], axis=-1)


def incB_fwd(p, x):
    y1, y2, y3 = fused_1x1([p["b1"], p["b2a"], p["b3a"]], x)
    b1 = y1
    b2 = basic_conv(p["b2c"], basic_conv(p["b2b"], y2))
    b3 = y3
    for k in ("b3b", "b3c", "b3d", "b3e"):
        b3 = basic_conv(p[k], b3)
    bp = basic_conv(p["bp"], avg_pool_3x3_s1(x))
    return jnp.concatenate([b1, b2, b3, bp], axis=-1)


def incE_fwd(p, x):
    y1, y2 = fused_1x1([p["b1a"], p["b2a"]], x)
    b1 = basic_conv(p["b1b"], y1)
    b2 = y2
    for k in ("b2b", "b2c", "b2d"):
        b2 = basic_conv(p[k], b2)
    bp = pool2d_window(x, 3, 2, "max")
    return jnp.concatenate([b1, b2, bp], axis=-1)


def incC_fwd(p, x):
    y1, y2, y3 = fused_1x1([p["b1"], p["b2a"], p["b3a"]], x)
    b1 = y1
    b2 = jnp.concatenate([basic_conv(p["b2b"], y2), basic_conv(p["b2c"], y2)], axis=-1)
    b3 = basic_conv(p["b3b"], y3)
    b3 = jnp.concatenate([basic_conv(p["b3c"], b3), basic_conv(p["b3d"], b3)], axis=-1)
    bp = basic_conv(p["bp"], avg_pool_3x3_s1(x))
    return jnp.concatenate([b1, b2, b3, bp], axis=-1)


def aux_fwd(p, x):
    x = pool2d_window(x, 5, 3, "avg")        # 17x17 -> 5x5
    x = basic_conv(p["conv1"], x)            # 1x1 -> 128
    x = basic_conv(p["conv2"], x)            # 5x5 -> 768, spatial 1x1
    x = x.reshape(x.shape[0], -1)
    return linear(p["fc"], x)


# ----------------------------------------------------------------------------- full model
def init_params(key, num_classes=10):
    pg = ParamGen(key)
    p = {}
    p["block1"] = [pg.conv(3, 32, 3, stride=2),
                   pg.conv(32, 32, 3),
                   pg.conv(32, 64, 3, padding=1)]
    p["block2"] = [pg.conv(64, 80, 3),
                   pg.conv(80, 192, 3, padding=1)]
    p["block3"] = [incA_params(pg, 192, [64, 48, 64, 64, 96, 32]),
                   incA_params(pg, 256, [64, 48, 64, 64, 96, 64]),
                   incA_params(pg, 288, [64, 48, 64, 64, 96, 64])]
    p["block4"] = [incD_params(pg, 288, [384, 384, 64, 96]),
                   incB_params(pg, 768, [192, 128, 192, 128, 192, 192]),
                   incB_params(pg, 768, [192, 160, 192, 160, 192, 192]),
                   incB_params(pg, 768, [192, 160, 192, 160, 192, 192]),
                   incB_params(pg, 768, [192, 192, 192, 192, 192, 192])]
    p["aux"] = dict(conv1=pg.conv(768, 128, 1),
                    conv2=pg.conv(128, 768, 5),
                    fc=pg.linear(768, num_classes))
    p["block5"] = [incE_params(pg, 768, [192, 320, 192, 192]),
                   incC_params(pg, 1280, [320, 384, 384, 448, 384, 192]),
                   incC_params(pg, 2048, [320, 384, 384, 448, 384, 192])]
    p["fc"] = pg.linear(2048, num_classes)
    return p


def inception_v3_forward(params, x_nchw):
    # layout: NCHW input (PyTorch convention) -> NHWC internally (channels on lanes), bf16.
    x = jnp.transpose(x_nchw, (0, 2, 3, 1)).astype(ACT_DTYPE)

    # block_1
    for p in params["block1"]:
        x = basic_conv(p, x)
    x = pool2d_window(x, 3, 2, "max")                   # 147 -> 73
    # block_2
    for p in params["block2"]:
        x = basic_conv(p, x)
    x = pool2d_window(x, 3, 2, "max")                   # 71 -> 35
    # block_3
    for p in params["block3"]:
        x = incA_fwd(p, x)                              # 35x35x288
    # block_4
    x = incD_fwd(params["block4"][0], x)                # 17x17x768
    for p in params["block4"][1:]:
        x = incB_fwd(p, x)
    aux_in = x
    # block_5
    x = incE_fwd(params["block5"][0], x)                # 8x8x1280
    for p in params["block5"][1:]:
        x = incC_fwd(p, x)                              # 8x8x2048
    # head: MaxPool2d(kernel_size=8, stride=1) on an 8x8 map == global max
    x = global_max_pool(x)                              # (N, 2048)
    # TODO(synk): Dropout(p=0.5) train-mode stochastic masking skipped (identity).
    out = linear(params["fc"], x)
    aux = aux_fwd(params["aux"], aux_in)
    return aux, out


# ----------------------------------------------------------------------------- main
if __name__ == "__main__":
    num_classes = 10
    key = jax.random.PRNGKey(0)
    params = init_params(key, num_classes=num_classes)
    # 299x299 is the spatial size implied by the module (MaxPool2d(8) + Linear(2048)).
    x = jax.random.normal(jax.random.fold_in(key, 999), (2, 3, 299, 299), jnp.float32)

    aux, out = inception_v3_forward(params, x)
    aux, out = jax.block_until_ready((aux, out))

    assert aux.shape == (2, num_classes) and out.shape == (2, num_classes)
    assert bool(jnp.all(jnp.isfinite(aux))) and bool(jnp.all(jnp.isfinite(out)))
    print("KERNEL_OK")
</pallas_src>

<mosaic_0001>
module attributes {stable_mosaic.version = 11 : i64} {
  func.func @kernel(%arg0: i32, %arg1: memref<512x27xbf16, #tpu.memory_space<vmem>>, %arg2: memref<27x32xbf16, #tpu.memory_space<vmem>>, %arg3: memref<1x32xf32, #tpu.memory_space<vmem>>, %arg4: memref<512x32xbf16, #tpu.memory_space<vmem>>) attributes {dimension_semantics = [#tpu.dimension_semantics<parallel>], iteration_bounds = array<i64: 87>, scalar_prefetch = 0 : i64, scratch_operands = 0 : i64, tpu.core_type = #tpu.core_type<tc>, window_params = [{transform_indices = @transform_0, window_bounds = array<i64: 512, 27>}, {pipeline_mode = #tpu.pipeline_mode<synchronous>, transform_indices = @transform_1, window_bounds = array<i64: 27, 32>}, {pipeline_mode = #tpu.pipeline_mode<synchronous>, transform_indices = @transform_2, window_bounds = array<i64: 1, 32>}, {transform_indices = @transform_3, window_bounds = array<i64: 512, 32>}]} {
    %c0 = arith.constant 0 : index
    %c0_0 = arith.constant 0 : index
    %0 = vector.load %arg1[%c0, %c0_0] : memref<512x27xbf16, #tpu.memory_space<vmem>>, vector<512x27xbf16>
    %c0_1 = arith.constant 0 : index
    %c0_2 = arith.constant 0 : index
    %1 = vector.load %arg2[%c0_1, %c0_2] : memref<27x32xbf16, #tpu.memory_space<vmem>>, vector<27x32xbf16>
    %cst = arith.constant dense<0.000000e+00> : vector<512x32xf32>
    %2 = tpu.matmul %0, %1, %cst {dimension_numbers = #tpu.dot_dimension_numbers<[1], [0], [0], [1], [0, 0, 1, 1], [], []>} : vector<512x27xbf16>, vector<27x32xbf16>, vector<512x32xf32> -> vector<512x32xf32>
    %c0_3 = arith.constant 0 : index
    %c0_4 = arith.constant 0 : index
    %3 = vector.load %arg3[%c0_3, %c0_4] : memref<1x32xf32, #tpu.memory_space<vmem>>, vector<1x32xf32>
    %4 = vector.broadcast %3 : vector<1x32xf32> to vector<512x32xf32>
    %5 = arith.addf %2, %4 : vector<512x32xf32>
    %cst_5 = arith.constant 0.000000e+00 : f32
    %6 = vector.broadcast %cst_5 : f32 to vector<512x32xf32>
    %7 = arith.maximumf %5, %6 : vector<512x32xf32>
    %8 = arith.truncf %7 : vector<512x32xf32> to vector<512x32xbf16>
    %c0_6 = arith.constant 0 : index
    %c0_7 = arith.constant 0 : index
    %9 = vector.load %arg4[%c0_6, %c0_7] : memref<512x32xbf16, #tpu.memory_space<vmem>>, vector<512x32xbf16>
    tpu.vector_store %arg4[%c0_6, %c0_7], %8 {strides = array<i32>} : memref<512x32xbf16, #tpu.memory_space<vmem>>, vector<512x32xbf16>,
    return
  }
  func.func @transform_0(%arg0: i32) -> (i32, i32) {
    %c0_i32 = arith.constant 0 : i32
    %c0_i32_0 = arith.constant 0 : i32
    return %arg0, %c0_i32 : i32, i32
  }
  func.func @transform_1(%arg0: i32) -> (i32, i32) {
    %c0_i32 = arith.constant 0 : i32
    %c0_i32_0 = arith.constant 0 : i32
    %c0_i32_1 = arith.constant 0 : i32
    return %c0_i32, %c0_i32_0 : i32, i32
  }
  func.func @transform_2(%arg0: i32) -> (i32, i32) {
    %c0_i32 = arith.constant 0 : i32
    %c0_i32_0 = arith.constant 0 : i32
    %c0_i32_1 = arith.constant 0 : i32
    return %c0_i32, %c0_i32_0 : i32, i32
  }
  func.func @transform_3(%arg0: i32) -> (i32, i32) {
    %c0_i32 = arith.constant 0 : i32
    %c0_i32_0 = arith.constant 0 : i32
    return %arg0, %c0_i32 : i32, i32
  }
}

</mosaic_0001>

<bundles_post_ra>
// kernel: tpu_custom_call.1
= control target key start
LH: loop header
LB: loop body
LE: loop exit
PB: predicated region body
PF: predicated region fallthrough
CT: control target
= control target key end

     0   :  { %s1198_s12 = smov 0   ;;  %s1496_s0 = inlined_call_operand.vmem [shape: bf16[44544,27], index: 0, kind: input, shape index: {}]   ;;  %s1497_s1 = inlined_call_operand.vmem [shape: bf16[27,32], index: 1, kind: input, shape index: {}]   ;;  %s1498_s2 = inlined_call_operand.vmem [shape: f32[1,32], index: 2, kind: input, shape index: {}]   ;;  %s1499_s3 = inlined_call_operand.vmem [shape: bf16[44544,32], index: 3, kind: output, shape index: {}]  }
   0x1 LB: > { %s940_s13 = sadd.s32 4294967295, %s1175_s12   ;;  %p944_p0 = scmp.ge.s32.totalorder %s1175_s12, 1  ;;  %s1175_s12 = sphi %s1198_s12, %s13_s12  }
   0x2   : > { %p138_p1 = scmp.lt.s32.totalorder %s1175_s12, 88 }
   0x4   : > { %p139_p2 = pnand %p944_p0, %p138_p1 }
   0x5   : > { %s945_s18 = sshll.u32 (!%p139_p2), %s940_s13, 6 }
   0x6   : > { %142 = sbr.rel (%p139_p2) target bundleno = 285 (0x11d), region = 32  ;;  %p163_p3 = scmp.lt.s32.totalorder (!%p139_p2), %s945_s18, 5567 }
   0xb   : > { %v1083_v0 = vld [vmem:[%s1497_s1 + $0x8] sm:$0xf]  ;;  %v1152_v1 = vld [vmem:[%s1497_s1 + $0x8] sm:$0x30]  ;;  %vm515_vm0 = vcmask 1044480   ;;  %vm516_vm1 = vcmask 1045504  }
   0xc   : > { %v1084_v2 = vor.u32 %v1152_v1, %v1083_v0  ;;  %v1177_v3 = vmov 65535   ;;  %s1501_s18 = smov (!%p163_p3, %s945_s18), 5567  ;;  %v1151_v7 = vld [vmem:[%s1497_s1] sm:$0xff]  ;;  %vm418_vm2 = vcmask 220160   ;;  %vm819_vm3 = vcmask 257024  }
   0xd   : > { %v517_v4 = vsel %vm515_vm0, 4294967295, %v1177_v3  ;;  %s946_s21 = sshll.u32 %s1501_s18, 2  ;;  %v1292_v40 = vld [vmem:[%s1498_s2] ss:$0 sm:$0xff] }
   0xe   : > { %v518_v5 = vsel %vm516_vm1, %v517_v4, 0  ;;  %s1223_s24 = scalar_lea.vmem %s1496_s0, %s946_s21  ;;  %s1301_s29 = scalar_lea.vmem %s1499_s3, %s946_s21 }
   0xf   : > { %v520_v6 = vand.u32 %v1084_v2, %v518_v5  ;;  %v1119_v8 = vld [vmem:[%s1223_s24] sm:$0xff]  ;;  %v1120_v12 = vld [vmem:[%s1223_s24 + $0x8] sm:$0xff]  ;;  %v1121_v16 = vld [vmem:[%s1223_s24 + $0x10] sm:$0xff] }
  0x10   : > { %v1127_v9 = vld [vmem:[%s1223_s24 + $0x40] sm:$0xff]  ;;  %v1128_v13 = vld [vmem:[%s1223_s24 + $0x48] sm:$0xff]  ;;  %v1129_v17 = vld [vmem:[%s1223_s24 + $0x50] sm:$0xff] }
  0x11   : > { %528 = vmatpush.bf16.msra.mxu0 %v520_v6  ;;  %1153 = vmatpush.bf16.msra.mxu1 %v520_v6  ;;  %v1135_v10 = vld [vmem:[%s1223_s24 + $0x80] sm:$0xff]  ;;  %v1136_v14 = vld [vmem:[%s1223_s24 + $0x88] sm:$0xff]  ;;  %v1137_v18 = vld [vmem:[%s1223_s24 + $0x90] sm:$0xff] }
  0x12   : > { %1154 = vmatpush.bf16.msra.mxu2 %v520_v6  ;;  %1155 = vmatpush.bf16.msra.mxu3 %v520_v6  ;;  %v1143_v11 = vld [vmem:[%s1223_s24 + $0xc0] sm:$0xff]  ;;  %v1144_v15 = vld [vmem:[%s1223_s24 + $0xc8] sm:$0xff]  ;;  %v1145_v19 = vld [vmem:[%s1223_s24 + $0xd0] sm:$0xff] }
  0x13   : > { %v1122_v20 = vld [vmem:[%s1223_s24 + $0x18] sm:$0xff]  ;;  %v1123_v24 = vld [vmem:[%s1223_s24 + $0x20] sm:$0xff]  ;;  %v1124_v28 = vld [vmem:[%s1223_s24 + $0x28] sm:$0xff] }
  0x14   : > { %v1130_v21 = vld [vmem:[%s1223_s24 + $0x58] sm:$0xff]  ;;  %v1131_v25 = vld [vmem:[%s1223_s24 + $0x60] sm:$0xff]  ;;  %v1132_v29 = vld [vmem:[%s1223_s24 + $0x68] sm:$0xff] }
  0x15   : > { %529 = vmatpush.bf16.msra.mxu0 %v1151_v7  ;;  %1156 = vmatpush.bf16.msra.mxu1 %v1151_v7  ;;  %v1138_v22 = vld [vmem:[%s1223_s24 + $0x98] sm:$0xff]  ;;  %v1139_v26 = vld [vmem:[%s1223_s24 + $0xa0] sm:$0xff]  ;;  %v1140_v30 = vld [vmem:[%s1223_s24 + $0xa8] sm:$0xff] }
  0x16   : > { %1157 = vmatpush.bf16.msra.mxu2 %v1151_v7  ;;  %1158 = vmatpush.bf16.msra.mxu3 %v1151_v7  ;;  %v1146_v23 = vld [vmem:[%s1223_s24 + $0xd8] sm:$0xff]  ;;  %v1147_v27 = vld [vmem:[%s1223_s24 + $0xe0] sm:$0xff]  ;;  %v1148_v31 = vld [vmem:[%s1223_s24 + $0xe8] sm:$0xff] }
  0x17   : > { %v1125_v32 = vld [vmem:[%s1223_s24 + $0x30] sm:$0xff]  ;;  %v1126_v36 = vld [vmem:[%s1223_s24 + $0x38] sm:$0xff] }
  0x18   : > { %1085 = vmatmul.msk.bf16.vlgmr.msra.gmra.mxu0 %vm418_vm2, %v1119_v8  ;;  %1093 = vmatmul.msk.bf16.vlgmr.msra.gmra.mxu1 %vm418_vm2, %v1127_v9  ;;  %v1133_v33 = vld [vmem:[%s1223_s24 + $0x70] sm:$0xff]  ;;  %v1134_v37 = vld [vmem:[%s1223_s24 + $0x78] sm:$0xff] }
  0x19   : > { %1101 = vmatmul.msk.bf16.vlgmr.msra.gmra.mxu2 %vm418_vm2, %v1135_v10  ;;  %1109 = vmatmul.msk.bf16.vlgmr.msra.gmra.mxu3 %vm418_vm2, %v1143_v11  ;;  %v1141_v34 = vld [vmem:[%s1223_s24 + $0xb0] sm:$0xff]  ;;  %v1142_v38 = vld [vmem:[%s1223_s24 + $0xb8] sm:$0xff] }
  0x1a   : > { %v1149_v35 = vld [vmem:[%s1223_s24 + $0xf0] sm:$0xff]  ;;  %v1150_v39 = vld [vmem:[%s1223_s24 + $0xf8] sm:$0xff] }
  0x28   : > { %1086 = vmatmul.msk.bf16.gmra.mxu0 %vm418_vm2, %v1120_v12  ;;  %1094 = vmatmul.msk.bf16.gmra.mxu1 %vm418_vm2, %v1128_v13 }
  0x29   : > { %1102 = vmatmul.msk.bf16.gmra.mxu2 %vm418_vm2, %v1136_v14  ;;  %1110 = vmatmul.msk.bf16.gmra.mxu3 %vm418_vm2, %v1144_v15 }
  0x38   : > { %1087 = vmatmul.msk.bf16.gmra.mxu0 %vm418_vm2, %v1121_v16  ;;  %1095 = vmatmul.msk.bf16.gmra.mxu1 %vm418_vm2, %v1129_v17 }
  0x39   : > { %1103 = vmatmul.msk.bf16.gmra.mxu2 %vm418_vm2, %v1137_v18  ;;  %1111 = vmatmul.msk.bf16.gmra.mxu3 %vm418_vm2, %v1145_v19 }
  0x48   : > { %1088 = vmatmul.msk.bf16.gmra.mxu0 %vm418_vm2, %v1122_v20  ;;  %1096 = vmatmul.msk.bf16.gmra.mxu1 %vm418_vm2, %v1130_v21 }
  0x49   : > { %1104 = vmatmul.msk.bf16.gmra.mxu2 %vm418_vm2, %v1138_v22  ;;  %1112 = vmatmul.msk.bf16.gmra.mxu3 %vm418_vm2, %v1146_v23 }
  0x58   : > { %1089 = vmatmul.msk.bf16.gmra.mxu0 %vm418_vm2, %v1123_v24  ;;  %1097 = vmatmul.msk.bf16.gmra.mxu1 %vm418_vm2, %v1131_v25 }
  0x59   : > { %1105 = vmatmul.msk.bf16.gmra.mxu2 %vm418_vm2, %v1139_v26  ;;  %1113 = vmatmul.msk.bf16.gmra.mxu3 %vm418_vm2, %v1147_v27 }
  0x68   : > { %1090 = vmatmul.msk.bf16.gmra.mxu0 %vm418_vm2, %v1124_v28  ;;  %1098 = vmatmul.msk.bf16.gmra.mxu1 %vm418_vm2, %v1132_v29 }
  0x69   : > { %1106 = vmatmul.msk.bf16.gmra.mxu2 %vm418_vm2, %v1140_v30  ;;  %1114 = vmatmul.msk.bf16.gmra.mxu3 %vm418_vm2, %v1148_v31 }
  0x78   : > { %1091 = vmatmul.msk.bf16.gmra.mxu0 %vm418_vm2, %v1125_v32  ;;  %1099 = vmatmul.msk.bf16.gmra.mxu1 %vm418_vm2, %v1133_v33 }
  0x79   : > { %1107 = vmatmul.msk.bf16.gmra.mxu2 %vm418_vm2, %v1141_v34  ;;  %1115 = vmatmul.msk.bf16.gmra.mxu3 %vm418_vm2, %v1149_v35 }
  0x88   : > { %1092 = vmatmul.msk.bf16.gmra.mxu0 %vm418_vm2, %v1126_v36  ;;  %1100 = vmatmul.msk.bf16.gmra.mxu1 %vm418_vm2, %v1134_v37 }
  0x89   : > { %1108 = vmatmul.msk.bf16.gmra.mxu2 %vm418_vm2, %v1142_v38  ;;  %1116 = vmatmul.msk.bf16.gmra.mxu3 %vm418_vm2, %v1150_v39 }
  0x95   : > { %v531_v41 = vpop.f32.mrf.mxu0  ;;  %v571_v42 = vpop.f32.mrf.mxu1 }
  0x96   : > { %v532_v43 = vadd.f32 %v1292_v40, %v531_v41  ;;  %v572_v44 = vadd.f32 %v1292_v40, %v571_v42 }
  0x98   : > { %v691_v45 = vmax.f32 %v532_v43, 0.0  ;;  %v707_v46 = vmax.f32 %v572_v44, 0.0 }
  0x9a   : > { %v755_v47 = vpack.c.bf16 %v691_v45, %v691_v45  ;;  %v771_v48 = vpack.c.bf16 %v707_v46, %v707_v46 }
  0x9c   : > { %820 = vst.msk [vmem:[%s1301_s29] sm:$0xf] %vm819_vm3, %v755_v47  ;;  %v611_v49 = vpop.f32.mrf.mxu2  ;;  %v651_v50 = vpop.f32.mrf.mxu3 }
  0x9d   : > { %836 = vst.msk [vmem:[%s1301_s29 + $0x40] sm:$0xf] %vm819_vm3, %v771_v48  ;;  %v612_v51 = vadd.f32 %v1292_v40, %v611_v49  ;;  %v652_v52 = vadd.f32 %v1292_v40, %v651_v50  ;;  %v533_v53 = vpop.f32.mrf.mxu0  ;;  %v573_v54 = vpop.f32.mrf.mxu1 }
  0x9e   : > { %v534_v55 = vadd.f32 %v1292_v40, %v533_v53  ;;  %v574_v56 = vadd.f32 %v1292_v40, %v573_v54 }
  0x9f   : > { %v723_v57 = vmax.f32 %v612_v51, 0.0  ;;  %v739_v58 = vmax.f32 %v652_v52, 0.0 }
  0xa0   : > { %v692_v59 = vmax.f32 %v534_v55, 0.0  ;;  %v708_v60 = vmax.f32 %v574_v56, 0.0 }
  0xa1   : > { %v787_v61 = vpack.c.bf16 %v723_v57, %v723_v57  ;;  %v803_v62 = vpack.c.bf16 %v739_v58, %v739_v58 }
  0xa2   : > { %v756_v63 = vpack.c.bf16 %v692_v59, %v692_v59  ;;  %v772_v0 = vpack.c.bf16 %v708_v60, %v708_v60 }
  0xa3   : > { %852 = vst.msk [vmem:[%s1301_s29 + $0x80] sm:$0xf] %vm819_vm3, %v787_v61 }
  0xa4   : > { %868 = vst.msk [vmem:[%s1301_s29 + $0xc0] sm:$0xf] %vm819_vm3, %v803_v62  ;;  %v613_v1 = vpop.f32.mrf.mxu2  ;;  %v653_v2 = vpop.f32.mrf.mxu3 }
  0xa5   : > { %821 = vst.msk [vmem:[%s1301_s29 + $0x4] sm:$0xf] %vm819_vm3, %v756_v63  ;;  %v614_v3 = vadd.f32 %v1292_v40, %v613_v1  ;;  %v654_v4 = vadd.f32 %v1292_v40, %v653_v2  ;;  %v536_v5 = vpop.f32.mrf.mxu0  ;;  %v576_v6 = vpop.f32.mrf.mxu1 }
  0xa6   : > { %837 = vst.msk [vmem:[%s1301_s29 + $0x44] sm:$0xf] %vm819_vm3, %v772_v0  ;;  %v537_v7 = vadd.f32 %v1292_v40, %v536_v5  ;;  %v577_v8 = vadd.f32 %v1292_v40, %v576_v6 }
  0xa7   : > { %v724_v9 = vmax.f32 %v614_v3, 0.0  ;;  %v740_v10 = vmax.f32 %v654_v4, 0.0 }
  0xa8   : > { %v693_v11 = vmax.f32 %v537_v7, 0.0  ;;  %v709_v12 = vmax.f32 %v577_v8, 0.0 }
  0xa9   : > { %v788_v13 = vpack.c.bf16 %v724_v9, %v724_v9  ;;  %v804_v14 = vpack.c.bf16 %v740_v10, %v740_v10 }
  0xaa   : > { %v757_v15 = vpack.c.bf16 %v693_v11, %v693_v11  ;;  %v773_v16 = vpack.c.bf16 %v709_v12, %v709_v12 }
  0xab   : > { %853 = vst.msk [vmem:[%s1301_s29 + $0x84] sm:$0xf] %vm819_vm3, %v788_v13 }
  0xac   : > { %869 = vst.msk [vmem:[%s1301_s29 + $0xc4] sm:$0xf] %vm819_vm3, %v804_v14  ;;  %v616_v17 = vpop.f32.mrf.mxu2  ;;  %v656_v18 = vpop.f32.mrf.mxu3 }
  0xad   : > { %822 = vst.msk [vmem:[%s1301_s29 + $0x8] sm:$0xf] %vm819_vm3, %v757_v15  ;;  %v617_v19 = vadd.f32 %v1292_v40, %v616_v17  ;;  %v657_v20 = vadd.f32 %v1292_v40, %v656_v18  ;;  %v538_v21 = vpop.f32.mrf.mxu0  ;;  %v578_v22 = vpop.f32.mrf.mxu1 }
  0xae   : > { %838 = vst.msk [vmem:[%s1301_s29 + $0x48] sm:$0xf] %vm819_vm3, %v773_v16  ;;  %v539_v23 = vadd.f32 %v1292_v40, %v538_v21  ;;  %v579_v24 = vadd.f32 %v1292_v40, %v578_v22 }
  0xaf   : > { %v725_v25 = vmax.f32 %v617_v19, 0.0  ;;  %v741_v26 = vmax.f32 %v657_v20, 0.0 }
  0xb0   : > { %v694_v27 = vmax.f32 %v539_v23, 0.0  ;;  %v710_v28 = vmax.f32 %v579_v24, 0.0 }
  0xb1   : > { %v789_v29 = vpack.c.bf16 %v725_v25, %v725_v25  ;;  %v805_v30 = vpack.c.bf16 %v741_v26, %v741_v26 }
  0xb2   : > { %v758_v31 = vpack.c.bf16 %v694_v27, %v694_v27  ;;  %v774_v32 = vpack.c.bf16 %v710_v28, %v710_v28 }
  0xb3   : > { %854 = vst.msk [vmem:[%s1301_s29 + $0x88] sm:$0xf] %vm819_vm3, %v789_v29 }
  0xb4   : > { %870 = vst.msk [vmem:[%s1301_s29 + $0xc8] sm:$0xf] %vm819_vm3, %v805_v30  ;;  %v618_v33 = vpop.f32.mrf.mxu2  ;;  %v658_v34 = vpop.f32.mrf.mxu3 }
  0xb5   : > { %823 = vst.msk [vmem:[%s1301_s29 + $0xc] sm:$0xf] %vm819_vm3, %v758_v31  ;;  %v619_v35 = vadd.f32 %v1292_v40, %v618_v33  ;;  %v659_v36 = vadd.f32 %v1292_v40, %v658_v34  ;;  %v541_v37 = vpop.f32.mrf.mxu0  ;;  %v581_v38 = vpop.f32.mrf.mxu1 }
  0xb6   : > { %839 = vst.msk [vmem:[%s1301_s29 + $0x4c] sm:$0xf] %vm819_vm3, %v774_v32  ;;  %v542_v39 = vadd.f32 %v1292_v40, %v541_v37  ;;  %v582_v41 = vadd.f32 %v1292_v40, %v581_v38 }
  0xb7   : > { %v726_v42 = vmax.f32 %v619_v35, 0.0  ;;  %v742_v43 = vmax.f32 %v659_v36, 0.0 }
  0xb8   : > { %v695_v44 = vmax.f32 %v542_v39, 0.0  ;;  %v711_v45 = vmax.f32 %v582_v41, 0.0 }
  0xb9   : > { %v790_v46 = vpack.c.bf16 %v726_v42, %v726_v42  ;;  %v806_v47 = vpack.c.bf16 %v742_v43, %v742_v43 }
  0xba   : > { %v759_v48 = vpack.c.bf16 %v695_v44, %v695_v44  ;;  %v775_v49 = vpack.c.bf16 %v711_v45, %v711_v45 }
  0xbb   : > { %855 = vst.msk [vmem:[%s1301_s29 + $0x8c] sm:$0xf] %vm819_vm3, %v790_v46 }
  0xbc   : > { %871 = vst.msk [vmem:[%s1301_s29 + $0xcc] sm:$0xf] %vm819_vm3, %v806_v47  ;;  %v621_v50 = vpop.f32.mrf.mxu2  ;;  %v661_v51 = vpop.f32.mrf.mxu3 }
  0xbd   : > { %824 = vst.msk [vmem:[%s1301_s29 + $0x10] sm:$0xf] %vm819_vm3, %v759_v48  ;;  %v622_v52 = vadd.f32 %v1292_v40, %v621_v50  ;;  %v662_v53 = vadd.f32 %v1292_v40, %v661_v51  ;;  %v543_v54 = vpop.f32.mrf.mxu0  ;;  %v583_v55 = vpop.f32.mrf.mxu1 }
  0xbe   : > { %840 = vst.msk [vmem:[%s1301_s29 + $0x50] sm:$0xf] %vm819_vm3, %v775_v49  ;;  %v544_v56 = vadd.f32 %v1292_v40, %v543_v54  ;;  %v584_v57 = vadd.f32 %v1292_v40, %v583_v55 }
  0xbf   : > { %v727_v58 = vmax.f32 %v622_v52, 0.0  ;;  %v743_v59 = vmax.f32 %v662_v53, 0.0 }
  0xc0   : > { %v696_v60 = vmax.f32 %v544_v56, 0.0  ;;  %v712_v61 = vmax.f32 %v584_v57, 0.0 }
  0xc1   : > { %v791_v62 = vpack.c.bf16 %v727_v58, %v727_v58  ;;  %v807_v63 = vpack.c.bf16 %v743_v59, %v743_v59 }
  0xc2   : > { %v760_v0 = vpack.c.bf16 %v696_v60, %v696_v60  ;;  %v776_v1 = vpack.c.bf16 %v712_v61, %v712_v61 }
  0xc3   : > { %856 = vst.msk [vmem:[%s1301_s29 + $0x90] sm:$0xf] %vm819_vm3, %v791_v62 }
  0xc4   : > { %872 = vst.msk [vmem:[%s1301_s29 + $0xd0] sm:$0xf] %vm819_vm3, %v807_v63  ;;  %v623_v2 = vpop.f32.mrf.mxu2  ;;  %v663_v3 = vpop.f32.mrf.mxu3 }
  0xc5   : > { %825 = vst.msk [vmem:[%s1301_s29 + $0x14] sm:$0xf] %vm819_vm3, %v760_v0  ;;  %v624_v4 = vadd.f32 %v1292_v40, %v623_v2  ;;  %v664_v5 = vadd.f32 %v1292_v40, %v663_v3  ;;  %v546_v6 = vpop.f32.mrf.mxu0  ;;  %v586_v7 = vpop.f32.mrf.mxu1 }
  0xc6   : > { %841 = vst.msk [vmem:[%s1301_s29 + $0x54] sm:$0xf] %vm819_vm3, %v776_v1  ;;  %v547_v8 = vadd.f32 %v1292_v40, %v546_v6  ;;  %v587_v9 = vadd.f32 %v1292_v40, %v586_v7 }
  0xc7   : > { %v728_v10 = vmax.f32 %v624_v4, 0.0  ;;  %v744_v11 = vmax.f32 %v664_v5, 0.0 }
  0xc8   : > { %v697_v12 = vmax.f32 %v547_v8, 0.0  ;;  %v713_v13 = vmax.f32 %v587_v9, 0.0 }
  0xc9   : > { %v792_v14 = vpack.c.bf16 %v728_v10, %v728_v10  ;;  %v808_v15 = vpack.c.bf16 %v744_v11, %v744_v11 }
  0xca   : > { %v761_v16 = vpack.c.bf16 %v697_v12, %v697_v12  ;;  %v777_v17 = vpack.c.bf16 %v713_v13, %v713_v13 }
  0xcb   : > { %857 = vst.msk [vmem:[%s1301_s29 + $0x94] sm:$0xf] %vm819_vm3, %v792_v14 }
  0xcc   : > { %873 = vst.msk [vmem:[%s1301_s29 + $0xd4] sm:$0xf] %vm819_vm3, %v808_v15  ;;  %v626_v18 = vpop.f32.mrf.mxu2  ;;  %v666_v19 = vpop.f32.mrf.mxu3 }
  0xcd   : > { %826 = vst.msk [vmem:[%s1301_s29 + $0x18] sm:$0xf] %vm819_vm3, %v761_v16  ;;  %v627_v20 = vadd.f32 %v1292_v40, %v626_v18  ;;  %v667_v21 = vadd.f32 %v1292_v40, %v666_v19  ;;  %v548_v22 = vpop.f32.mrf.mxu0  ;;  %v588_v23 = vpop.f32.mrf.mxu1 }
  0xce   : > { %842 = vst.msk [vmem:[%s1301_s29 + $0x58] sm:$0xf] %vm819_vm3, %v777_v17  ;;  %v549_v24 = vadd.f32 %v1292_v40, %v548_v22  ;;  %v589_v25 = vadd.f32 %v1292_v40, %v588_v23 }
  0xcf   : > { %v729_v26 = vmax.f32 %v627_v20, 0.0  ;;  %v745_v27 = vmax.f32 %v667_v21, 0.0 }
  0xd0   : > { %v698_v28 = vmax.f32 %v549_v24, 0.0  ;;  %v714_v29 = vmax.f32 %v589_v25, 0.0 }
  0xd1   : > { %v793_v30 = vpack.c.bf16 %v729_v26, %v729_v26  ;;  %v809_v31 = vpack.c.bf16 %v745_v27, %v745_v27 }
  0xd2   : > { %v762_v32 = vpack.c.bf16 %v698_v28, %v698_v28  ;;  %v778_v33 = vpack.c.bf16 %v714_v29, %v714_v29 }
  0xd3   : > { %858 = vst.msk [vmem:[%s1301_s29 + $0x98] sm:$0xf] %vm819_vm3, %v793_v30 }
  0xd4   : > { %874 = vst.msk [vmem:[%s1301_s29 + $0xd8] sm:$0xf] %vm819_vm3, %v809_v31  ;;  %v628_v34 = vpop.f32.mrf.mxu2  ;;  %v668_v35 = vpop.f32.mrf.mxu3 }
  0xd5   : > { %827 = vst.msk [vmem:[%s1301_s29 + $0x1c] sm:$0xf] %vm819_vm3, %v762_v32  ;;  %v629_v36 = vadd.f32 %v1292_v40, %v628_v34  ;;  %v669_v37 = vadd.f32 %v1292_v40, %v668_v35  ;;  %v551_v38 = vpop.f32.mrf.mxu0  ;;  %v591_v39 = vpop.f32.mrf.mxu1 }
  0xd6   : > { %843 = vst.msk [vmem:[%s1301_s29 + $0x5c] sm:$0xf] %vm819_vm3, %v778_v33  ;;  %v552_v41 = vadd.f32 %v1292_v40, %v551_v38  ;;  %v592_v42 = vadd.f32 %v1292_v40, %v591_v39 }
  0xd7   : > { %v730_v43 = vmax.f32 %v629_v36, 0.0  ;;  %v746_v44 = vmax.f32 %v669_v37, 0.0 }
  0xd8   : > { %v699_v45 = vmax.f32 %v552_v41, 0.0  ;;  %v715_v46 = vmax.f32 %v592_v42, 0.0 }
  0xd9   : > { %v794_v47 = vpack.c.bf16 %v730_v43, %v730_v43  ;;  %v810_v48 = vpack.c.bf16 %v746_v44, %v746_v44 }
  0xda   : > { %v763_v49 = vpack.c.bf16 %v699_v45, %v699_v45  ;;  %v779_v50 = vpack.c.bf16 %v715_v46, %v715_v46 }
  0xdb   : > { %859 = vst.msk [vmem:[%s1301_s29 + $0x9c] sm:$0xf] %vm819_vm3, %v794_v47 }
  0xdc   : > { %875 = vst.msk [vmem:[%s1301_s29 + $0xdc] sm:$0xf] %vm819_vm3, %v810_v48  ;;  %v631_v51 = vpop.f32.mrf.mxu2  ;;  %v671_v52 = vpop.f32.mrf.mxu3 }
  0xdd   : > { %828 = vst.msk [vmem:[%s1301_s29 + $0x20] sm:$0xf] %vm819_vm3, %v763_v49  ;;  %v632_v53 = vadd.f32 %v1292_v40, %v631_v51  ;;  %v672_v54 = vadd.f32 %v1292_v40, %v671_v52  ;;  %v553_v55 = vpop.f32.mrf.mxu0  ;;  %v593_v56 = vpop.f32.mrf.mxu1 }
  0xde   : > { %844 = vst.msk [vmem:[%s1301_s29 + $0x60] sm:$0xf] %vm819_vm3, %v779_v50  ;;  %v554_v57 = vadd.f32 %v1292_v40, %v553_v55  ;;  %v594_v58 = vadd.f32 %v1292_v40, %v593_v56 }
  0xdf   : > { %v731_v59 = vmax.f32 %v632_v53, 0.0  ;;  %v747_v60 = vmax.f32 %v672_v54, 0.0 }
  0xe0   : > { %v700_v61 = vmax.f32 %v554_v57, 0.0  ;;  %v716_v62 = vmax.f32 %v594_v58, 0.0 }
  0xe1   : > { %v795_v63 = vpack.c.bf16 %v731_v59, %v731_v59  ;;  %v811_v0 = vpack.c.bf16 %v747_v60, %v747_v60 }
  0xe2   : > { %v764_v1 = vpack.c.bf16 %v700_v61, %v700_v61  ;;  %v780_v2 = vpack.c.bf16 %v716_v62, %v716_v62 }
  0xe3   : > { %860 = vst.msk [vmem:[%s1301_s29 + $0xa0] sm:$0xf] %vm819_vm3, %v795_v63 }
  0xe4   : > { %876 = vst.msk [vmem:[%s1301_s29 + $0xe0] sm:$0xf] %vm819_vm3, %v811_v0  ;;  %v633_v3 = vpop.f32.mrf.mxu2  ;;  %v673_v4 = vpop.f32.mrf.mxu3 }
  0xe5   : > { %829 = vst.msk [vmem:[%s1301_s29 + $0x24] sm:$0xf] %vm819_vm3, %v764_v1  ;;  %v634_v5 = vadd.f32 %v1292_v40, %v633_v3  ;;  %v674_v6 = vadd.f32 %v1292_v40, %v673_v4  ;;  %v556_v7 = vpop.f32.mrf.mxu0  ;;  %v596_v8 = vpop.f32.mrf.mxu1 }
  0xe6   : > { %845 = vst.msk [vmem:[%s1301_s29 + $0x64] sm:$0xf] %vm819_vm3, %v780_v2  ;;  %v557_v9 = vadd.f32 %v1292_v40, %v556_v7  ;;  %v597_v10 = vadd.f32 %v1292_v40, %v596_v8 }
  0xe7   : > { %v732_v11 = vmax.f32 %v634_v5, 0.0  ;;  %v748_v12 = vmax.f32 %v674_v6, 0.0 }
  0xe8   : > { %v701_v13 = vmax.f32 %v557_v9, 0.0  ;;  %v717_v14 = vmax.f32 %v597_v10, 0.0 }
  0xe9   : > { %v796_v15 = vpack.c.bf16 %v732_v11, %v732_v11  ;;  %v812_v16 = vpack.c.bf16 %v748_v12, %v748_v12 }
  0xea   : > { %v765_v17 = vpack.c.bf16 %v701_v13, %v701_v13  ;;  %v781_v18 = vpack.c.bf16 %v717_v14, %v717_v14 }
  0xeb   : > { %861 = vst.msk [vmem:[%s1301_s29 + $0xa4] sm:$0xf] %vm819_vm3, %v796_v15 }
  0xec   : > { %877 = vst.msk [vmem:[%s1301_s29 + $0xe4] sm:$0xf] %vm819_vm3, %v812_v16  ;;  %v636_v19 = vpop.f32.mrf.mxu2  ;;  %v676_v20 = vpop.f32.mrf.mxu3 }
  0xed   : > { %830 = vst.msk [vmem:[%s1301_s29 + $0x28] sm:$0xf] %vm819_vm3, %v765_v17  ;;  %v637_v21 = vadd.f32 %v1292_v40, %v636_v19  ;;  %v677_v22 = vadd.f32 %v1292_v40, %v676_v20  ;;  %v558_v23 = vpop.f32.mrf.mxu0  ;;  %v598_v24 = vpop.f32.mrf.mxu1 }
  0xee   : > { %846 = vst.msk [vmem:[%s1301_s29 + $0x68] sm:$0xf] %vm819_vm3, %v781_v18  ;;  %v559_v25 = vadd.f32 %v1292_v40, %v558_v23  ;;  %v599_v26 = vadd.f32 %v1292_v40, %v598_v24 }
  0xef   : > { %v733_v27 = vmax.f32 %v637_v21, 0.0  ;;  %v749_v28 = vmax.f32 %v677_v22, 0.0 }
  0xf0   : > { %v702_v29 = vmax.f32 %v559_v25, 0.0  ;;  %v718_v30 = vmax.f32 %v599_v26, 0.0 }
  0xf1   : > { %v797_v31 = vpack.c.bf16 %v733_v27, %v733_v27  ;;  %v813_v32 = vpack.c.bf16 %v749_v28, %v749_v28 }
  0xf2   : > { %v766_v33 = vpack.c.bf16 %v702_v29, %v702_v29  ;;  %v782_v34 = vpack.c.bf16 %v718_v30, %v718_v30 }
  0xf3   : > { %862 = vst.msk [vmem:[%s1301_s29 + $0xa8] sm:$0xf] %vm819_vm3, %v797_v31 }
  0xf4   : > { %878 = vst.msk [vmem:[%s1301_s29 + $0xe8] sm:$0xf] %vm819_vm3, %v813_v32  ;;  %v638_v35 = vpop.f32.mrf.mxu2  ;;  %v678_v36 = vpop.f32.mrf.mxu3 }
  0xf5   : > { %831 = vst.msk [vmem:[%s1301_s29 + $0x2c] sm:$0xf] %vm819_vm3, %v766_v33  ;;  %v639_v37 = vadd.f32 %v1292_v40, %v638_v35  ;;  %v679_v38 = vadd.f32 %v1292_v40, %v678_v36  ;;  %v561_v39 = vpop.f32.mrf.mxu0  ;;  %v601_v41 = vpop.f32.mrf.mxu1 }
  0xf6   : > { %847 = vst.msk [vmem:[%s1301_s29 + $0x6c] sm:$0xf] %vm819_vm3, %v782_v34  ;;  %v562_v42 = vadd.f32 %v1292_v40, %v561_v39  ;;  %v602_v43 = vadd.f32 %v1292_v40, %v601_v41 }
  0xf7   : > { %v734_v44 = vmax.f32 %v639_v37, 0.0  ;;  %v750_v45 = vmax.f32 %v679_v38, 0.0 }
  0xf8   : > { %v703_v46 = vmax.f32 %v562_v42, 0.0  ;;  %v719_v47 = vmax.f32 %v602_v43, 0.0 }
  0xf9   : > { %v798_v48 = vpack.c.bf16 %v734_v44, %v734_v44  ;;  %v814_v49 = vpack.c.bf16 %v750_v45, %v750_v45 }
  0xfa   : > { %v767_v50 = vpack.c.bf16 %v703_v46, %v703_v46  ;;  %v783_v51 = vpack.c.bf16 %v719_v47, %v719_v47 }
  0xfb   : > { %863 = vst.msk [vmem:[%s1301_s29 + $0xac] sm:$0xf] %vm819_vm3, %v798_v48 }
  0xfc   : > { %879 = vst.msk [vmem:[%s1301_s29 + $0xec] sm:$0xf] %vm819_vm3, %v814_v49  ;;  %v641_v52 = vpop.f32.mrf.mxu2  ;;  %v681_v53 = vpop.f32.mrf.mxu3 }
  0xfd   : > { %832 = vst.msk [vmem:[%s1301_s29 + $0x30] sm:$0xf] %vm819_vm3, %v767_v50  ;;  %v642_v54 = vadd.f32 %v1292_v40, %v641_v52  ;;  %v682_v55 = vadd.f32 %v1292_v40, %v681_v53  ;;  %v563_v56 = vpop.f32.mrf.mxu0  ;;  %v603_v57 = vpop.f32.mrf.mxu1 }
  0xfe   : > { %848 = vst.msk [vmem:[%s1301_s29 + $0x70] sm:$0xf] %vm819_vm3, %v783_v51  ;;  %v564_v58 = vadd.f32 %v1292_v40, %v563_v56  ;;  %v604_v59 = vadd.f32 %v1292_v40, %v603_v57 }
  0xff   : > { %v735_v60 = vmax.f32 %v642_v54, 0.0  ;;  %v751_v61 = vmax.f32 %v682_v55, 0.0 }
 0x100   : > { %v704_v62 = vmax.f32 %v564_v58, 0.0  ;;  %v720_v63 = vmax.f32 %v604_v59, 0.0 }
 0x101   : > { %v799_v0 = vpack.c.bf16 %v735_v60, %v735_v60  ;;  %v815_v1 = vpack.c.bf16 %v751_v61, %v751_v61 }
 0x102   : > { %v768_v2 = vpack.c.bf16 %v704_v62, %v704_v62  ;;  %v784_v3 = vpack.c.bf16 %v720_v63, %v720_v63 }
 0x103   : > { %864 = vst.msk [vmem:[%s1301_s29 + $0xb0] sm:$0xf] %vm819_vm3, %v799_v0 }
 0x104   : > { %880 = vst.msk [vmem:[%s1301_s29 + $0xf0] sm:$0xf] %vm819_vm3, %v815_v1  ;;  %v643_v4 = vpop.f32.mrf.mxu2  ;;  %v683_v5 = vpop.f32.mrf.mxu3 }
 0x105   : > { %833 = vst.msk [vmem:[%s1301_s29 + $0x34] sm:$0xf] %vm819_vm3, %v768_v2  ;;  %v644_v6 = vadd.f32 %v1292_v40, %v643_v4  ;;  %v684_v7 = vadd.f32 %v1292_v40, %v683_v5  ;;  %v566_v8 = vpop.f32.mrf.mxu0  ;;  %v606_v9 = vpop.f32.mrf.mxu1 }
 0x106   : > { %849 = vst.msk [vmem:[%s1301_s29 + $0x74] sm:$0xf] %vm819_vm3, %v784_v3  ;;  %v567_v10 = vadd.f32 %v1292_v40, %v566_v8  ;;  %v607_v11 = vadd.f32 %v1292_v40, %v606_v9 }
 0x107   : > { %v736_v12 = vmax.f32 %v644_v6, 0.0  ;;  %v752_v13 = vmax.f32 %v684_v7, 0.0 }
 0x108   : > { %v705_v14 = vmax.f32 %v567_v10, 0.0  ;;  %v721_v15 = vmax.f32 %v607_v11, 0.0 }
 0x109   : > { %v800_v16 = vpack.c.bf16 %v736_v12, %v736_v12  ;;  %v816_v17 = vpack.c.bf16 %v752_v13, %v752_v13 }
 0x10a   : > { %v769_v18 = vpack.c.bf16 %v705_v14, %v705_v14  ;;  %v785_v19 = vpack.c.bf16 %v721_v15, %v721_v15 }
 0x10b   : > { %865 = vst.msk [vmem:[%s1301_s29 + $0xb4] sm:$0xf] %vm819_vm3, %v800_v16 }
 0x10c   : > { %881 = vst.msk [vmem:[%s1301_s29 + $0xf4] sm:$0xf] %vm819_vm3, %v816_v17  ;;  %v646_v20 = vpop.f32.mrf.mxu2  ;;  %v686_v21 = vpop.f32.mrf.mxu3 }
 0x10d   : > { %834 = vst.msk [vmem:[%s1301_s29 + $0x38] sm:$0xf] %vm819_vm3, %v769_v18  ;;  %v647_v22 = vadd.f32 %v1292_v40, %v646_v20  ;;  %v687_v23 = vadd.f32 %v1292_v40, %v686_v21  ;;  %v568_v24 = vpop.f32.mrf.mxu0  ;;  %v608_v25 = vpop.f32.mrf.mxu1 }
 0x10e   : > { %850 = vst.msk [vmem:[%s1301_s29 + $0x78] sm:$0xf] %vm819_vm3, %v785_v19  ;;  %v569_v26 = vadd.f32 %v1292_v40, %v568_v24  ;;  %v609_v27 = vadd.f32 %v1292_v40, %v608_v25 }
 0x10f   : > { %v737_v28 = vmax.f32 %v647_v22, 0.0  ;;  %v753_v29 = vmax.f32 %v687_v23, 0.0 }
 0x110   : > { %v706_v30 = vmax.f32 %v569_v26, 0.0  ;;  %v722_v31 = vmax.f32 %v609_v27, 0.0 }
 0x111   : > { %v801_v32 = vpack.c.bf16 %v737_v28, %v737_v28  ;;  %v817_v33 = vpack.c.bf16 %v753_v29, %v753_v29 }
 0x112   : > { %v770_v34 = vpack.c.bf16 %v706_v30, %v706_v30  ;;  %v786_v35 = vpack.c.bf16 %v722_v31, %v722_v31 }
 0x113   : > { %866 = vst.msk [vmem:[%s1301_s29 + $0xb8] sm:$0xf] %vm819_vm3, %v801_v32 }
 0x114   : > { %882 = vst.msk [vmem:[%s1301_s29 + $0xf8] sm:$0xf] %vm819_vm3, %v817_v33  ;;  %v648_v36 = vpop.f32.mrf.mxu2  ;;  %v688_v37 = vpop.f32.mrf.mxu3 }
 0x115   : > { %835 = vst.msk [vmem:[%s1301_s29 + $0x3c] sm:$0xf] %vm819_vm3, %v770_v34  ;;  %v649_v38 = vadd.f32 %v1292_v40, %v648_v36  ;;  %v689_v39 = vadd.f32 %v1292_v40, %v688_v37 }
 0x116   : > { %851 = vst.msk [vmem:[%s1301_s29 + $0x7c] sm:$0xf] %vm819_vm3, %v786_v35 }
 0x117   : > { %v738_v41 = vmax.f32 %v649_v38, 0.0  ;;  %v754_v42 = vmax.f32 %v689_v39, 0.0 }
 0x119   : > { %v802_v43 = vpack.c.bf16 %v738_v41, %v738_v41  ;;  %v818_v44 = vpack.c.bf16 %v754_v42, %v754_v42 }
 0x11b   : > { %867 = vst.msk [vmem:[%s1301_s29 + $0xbc] sm:$0xf] %vm819_vm3, %v802_v43 }
 0x11c   : > { %883 = vst.msk [vmem:[%s1301_s29 + $0xfc] sm:$0xf] %vm819_vm3, %v818_v44 }
 0x11d PF: > { %s13_s12 = sadd.s32 1, %s1175_s12  }
 0x11e   : > { %p10_p4 = scmp.ge.s32.totalorder %s13_s12, 89  }
 0x120   :  { %12 = sbr.rel (!%p10_p4) target bundleno = 1 (0x1), region = 62 }

</bundles_post_ra>
